<compile_context>
chip_gen: v5e
topology: v5e:2x2
jax: 0.10.0
libtpu: 0.0.40
codegen_flags: <defaults>
</compile_context>

<pallas_src>
from functools import partial

import jax
import jax.numpy as jnp
from jax.experimental import pallas as pl
from jax.experimental.pallas import tpu as pltpu


# ----------------------------------------------------------------------------
# TemporalAttention kernel
# ----------------------------------------------------------------------------
def _temporal_attention_kernel(h_ref, m_ref, w_ref, b_ref, t_ref,
                               ctx_ref, attn_ref, *, use_temporal):
    h = h_ref[...].astype(jnp.float32)            # [TB, S, H] (native dtype DMA)
    mask = m_ref[...]                             # [TB, S]
    w = w_ref[...].astype(jnp.float32)            # [1, H]
    b = b_ref[0, 0]                               # scalar bias from SMEM

    # attention_scores = Linear(hidden_states).squeeze(-1)  -> [TB, S]
    # VPU multiply + lane reduce (avoids a degenerate N=1 MXU matmul).
    scores = jnp.sum(h * w, axis=-1) + b

    # masked_fill(attention_mask == 0, -10000.0)
    scores = jnp.where(mask == 0, jnp.float32(-10000.0), scores)

    # softmax over seq dim (dim=1); denominator via EUP approx reciprocal.
    m_max = jnp.max(scores, axis=1, keepdims=True)
    e = jnp.exp(scores - m_max)
    attn = e * pl.reciprocal(jnp.sum(e, axis=1, keepdims=True), approx=True)

    if use_temporal:
        # token_weights[i] = temporal_weights[i][0]; renormalize with +1e-9.
        tw0 = t_ref[...].astype(jnp.float32)       # [TB, 1]
        attn = attn * tw0
        attn = attn * pl.reciprocal(
            jnp.sum(attn, axis=1, keepdims=True) + jnp.float32(1e-9), approx=True)

    # context_vector = bmm(attn.unsqueeze(1), hidden).squeeze(1) -> [TB, H]
    # VPU multiply + sublane reduce (avoids B serialized M=1 MXU matmuls).
    ctx = jnp.sum(attn[:, :, None] * h, axis=1)

    ctx_ref[...] = ctx.astype(ctx_ref.dtype)
    attn_ref[...] = attn.astype(attn_ref.dtype)


def temporal_attention(hidden_states, attention_mask, weight, bias,
                       temporal_weights=None):
    """Pallas equivalent of TemporalAttention.forward.

    hidden_states: [B, S, H] (native dtype; cast to fp32 inside the kernel)
    attention_mask: [B, S] (0/1)
    weight: [1, H], bias: [1]  (nn.Linear(hidden_size, 1) parameters)
    temporal_weights: optional [B, E]  (only column 0 used, per reference)
    Returns (context_vector [B, H], attention_weights [B, S] fp32).
    """
    B, S, H = hidden_states.shape
    use_temporal = temporal_weights is not None

    # Batch tiling: full-extent when B is small / odd, multiples of 8 otherwise
    # (satisfies the (8,128) rule on the second-minor dim of 2-D blocks).
    block_b = 8 if (B % 8 == 0) else B
    grid = (B // block_b,)

    if use_temporal:
        tw_col = jnp.asarray(temporal_weights)[:, 0:1].astype(jnp.float32)
    else:
        tw_col = jnp.ones((B, 1), jnp.float32)     # dummy, unused in kernel

    bias_smem = jnp.asarray(bias, jnp.float32).reshape(1, 1)
    w2d = jnp.asarray(weight).reshape(1, H)

    ctx, attn = pl.pallas_call(
        partial(_temporal_attention_kernel, use_temporal=use_temporal),
        grid=grid,
        in_specs=[
            pl.BlockSpec((block_b, S, H), lambda i: (i, 0, 0)),   # hidden
            pl.BlockSpec((block_b, S), lambda i: (i, 0)),         # mask
            pl.BlockSpec((1, H), lambda i: (0, 0)),               # weight row
            pl.BlockSpec(memory_space=pltpu.MemorySpace.SMEM),    # bias scalar
            pl.BlockSpec((block_b, 1), lambda i: (i, 0)),         # temporal col
        ],
        out_specs=(
            pl.BlockSpec((block_b, H), lambda i: (i, 0)),
            pl.BlockSpec((block_b, S), lambda i: (i, 0)),
        ),
        out_shape=(
            jax.ShapeDtypeStruct((B, H), hidden_states.dtype),
            jax.ShapeDtypeStruct((B, S), jnp.float32),
        ),
        compiler_params=pltpu.CompilerParams(
            dimension_semantics=("parallel",)),
    )(hidden_states, jnp.asarray(attention_mask), w2d, bias_smem, tw_col)
    return ctx, attn


# ----------------------------------------------------------------------------
# Prediction head kernel (everything after the context vector)
# ----------------------------------------------------------------------------
def _head_kernel(ctx_ref, prev_ref, pw_ref, pb_ref, cwx_ref, cwp_ref, cb_ref,
                 sw_ref, sb_ref, tw_ref, tb_ref, out_ref, *, use_prev):
    x = ctx_ref[...].astype(jnp.float32)                         # [B, H]

    if use_prev:
        prev = prev_ref[...].astype(jnp.float32)                 # [B, P]
        # prev_projection: K = num_prev_windows is tiny -> VPU multiply+reduce.
        pf = jnp.sum(prev[:, :, None] * pw_ref[...][None, :, :], axis=1) \
            + pb_ref[...]                                        # [B, H//2]
        # combined_layer(cat([ctx, pf])) without materializing the concat:
        # split weight into the ctx part and the prev-feature part.
        x = (jnp.dot(x, cwx_ref[...], preferred_element_type=jnp.float32)
             + jnp.dot(pf, cwp_ref[...], preferred_element_type=jnp.float32)
             + cb_ref[...])                                      # [B, H]

    shared = jnp.dot(x, sw_ref[...], preferred_element_type=jnp.float32) \
        + sb_ref[...]
    shared = jnp.maximum(shared, jnp.float32(0.0))               # ReLU
    # TODO(synk): nn.Dropout is identity in eval mode; training-mode dropout
    # would use pltpu.prng_seed / pltpu.prng_random_bits.

    # task heads: output dim = num_windows (tiny N) -> VPU multiply + reduce.
    logits = jnp.sum(shared[:, None, :] * tw_ref[...][None, :, :], axis=-1) \
        + tb_ref[...]                                            # [B, T]
    out_ref[...] = jax.nn.sigmoid(logits).astype(out_ref.dtype)


def multitask_tbi_forward(sequence_output, attention_mask, params,
                          temporal_weights=None, prev_window_preds=None):
    """Post-BERT forward of MultiTaskTBIPredictor.

    sequence_output: [B, S, H]  (BERT last_hidden_state)
    Returns (stacked_outputs [B, num_windows], attention_weights [B, S]).
    """
    ctx, attn = temporal_attention(sequence_output, attention_mask,
                                   params['attn_w'], params['attn_b'],
                                   temporal_weights)
    B, H = ctx.shape
    T = params['task_w'].shape[0]
    P = params['prev_w'].shape[1]

    use_prev = prev_window_preds is not None
    prev = (jnp.asarray(prev_window_preds, jnp.float32) if use_prev
            else jnp.zeros((B, P), jnp.float32))

    pw_t = params['prev_w'].T.astype(jnp.float32)                 # [P, H//2]
    pb2 = params['prev_b'].reshape(1, -1).astype(jnp.float32)
    cwx_t = params['comb_w'][:, :H].T.astype(jnp.float32)         # [H, H]
    cwp_t = params['comb_w'][:, H:].T.astype(jnp.float32)         # [H//2, H]
    cb2 = params['comb_b'].reshape(1, -1).astype(jnp.float32)
    sw_t = params['shared_w'].T.astype(jnp.float32)               # [H, H]
    sb2 = params['shared_b'].reshape(1, -1).astype(jnp.float32)
    tw = params['task_w'].astype(jnp.float32)                     # [T, H]
    tb2 = params['task_b'].reshape(1, -1).astype(jnp.float32)

    out = pl.pallas_call(
        partial(_head_kernel, use_prev=use_prev),
        out_shape=jax.ShapeDtypeStruct((B, T), jnp.float32),
        in_specs=[pl.BlockSpec(memory_space=pltpu.MemorySpace.VMEM)] * 11,
        out_specs=pl.BlockSpec(memory_space=pltpu.MemorySpace.VMEM),
    )(ctx, prev, pw_t, pb2, cwx_t, cwp_t, cb2, sw_t, sb2, tw, tb2)
    return out, attn


# ----------------------------------------------------------------------------
# Pure-JAX reference (mirror of the PyTorch forward) for verification
# ----------------------------------------------------------------------------
def _ref_temporal_attention(h, mask, w, b, tw=None):
    scores = jnp.einsum('bsh,h->bs', h, w[0]) + b[0]
    scores = jnp.where(mask == 0, -10000.0, scores)
    attn = jax.nn.softmax(scores, axis=1)
    if tw is not None:
        attn = attn * tw[:, 0:1]
        attn = attn / (attn.sum(axis=1, keepdims=True) + 1e-9)
    ctx = jnp.einsum('bs,bsh->bh', attn, h)
    return ctx, attn


def _ref_forward(seq_out, mask, params, tw=None, prev=None):
    ctx, attn = _ref_temporal_attention(seq_out, mask,
                                        params['attn_w'], params['attn_b'], tw)
    if prev is not None:
        pf = prev @ params['prev_w'].T + params['prev_b']
        comb = jnp.concatenate([ctx, pf], axis=1)
        ctx = comb @ params['comb_w'].T + params['comb_b']
    shared = jax.nn.relu(ctx @ params['shared_w'].T + params['shared_b'])
    logits = shared @ params['task_w'].T + params['task_b']
    return jax.nn.sigmoid(logits), attn


if __name__ == "__main__":
    B, S, H = 2, 8, 32
    T = 4                      # num_windows
    P = T - 1                  # num previous-window predictions
    key = jax.random.PRNGKey(0)
    keys = jax.random.split(key, 16)

    sequence_output = jax.random.normal(keys[0], (B, S, H), jnp.float32)
    # binary mask: last two tokens of batch 1 are padding
    attention_mask = jnp.ones((B, S), jnp.float32).at[1, S - 2:].set(0.0)
    temporal_weights = jax.random.uniform(keys[1], (B, T), jnp.float32,
                                          minval=0.1, maxval=1.0)
    prev_window_preds = jax.random.uniform(keys[2], (B, P), jnp.float32)

    def linear_init(k, out_f, in_f):
        kw, kb = jax.random.split(k)
        bound = 1.0 / jnp.sqrt(jnp.float32(in_f))
        w = jax.random.uniform(kw, (out_f, in_f), jnp.float32, -bound, bound)
        b = jax.random.uniform(kb, (out_f,), jnp.float32, -bound, bound)
        return w, b

    attn_w, attn_b = linear_init(keys[3], 1, H)
    prev_w, prev_b = linear_init(keys[4], H // 2, P)
    comb_w, comb_b = linear_init(keys[5], H, H + H // 2)
    shared_w, shared_b = linear_init(keys[6], H, H)
    task_ws, task_bs = [], []
    for t in range(T):
        w_t, b_t = linear_init(keys[7 + t], 1, H)
        task_ws.append(w_t[0])
        task_bs.append(b_t[0])
    task_w = jnp.stack(task_ws)        # [T, H]
    task_b = jnp.stack(task_bs)        # [T]

    params = dict(attn_w=attn_w, attn_b=attn_b, prev_w=prev_w, prev_b=prev_b,
                  comb_w=comb_w, comb_b=comb_b, shared_w=shared_w,
                  shared_b=shared_b, task_w=task_w, task_b=task_b)

    # Full path: temporal weights + previous-window predictions (365-day case).
    out, attn = multitask_tbi_forward(sequence_output, attention_mask, params,
                                      temporal_weights, prev_window_preds)
    jax.block_until_ready((out, attn))
    out_ref, attn_ref = _ref_forward(sequence_output, attention_mask, params,
                                     temporal_weights, prev_window_preds)
    assert out.shape == (B, T) and attn.shape == (B, S)
    assert jnp.allclose(out, out_ref, atol=5e-3, rtol=5e-3)
    assert jnp.allclose(attn, attn_ref, atol=5e-3, rtol=5e-3)

    # 30-day path: no temporal weights, no previous predictions.
    out2, attn2 = multitask_tbi_forward(sequence_output, attention_mask, params)
    jax.block_until_ready((out2, attn2))
    out2_ref, attn2_ref = _ref_forward(sequence_output, attention_mask, params)
    assert jnp.allclose(out2, out2_ref, atol=5e-3, rtol=5e-3)
    assert jnp.allclose(attn2, attn2_ref, atol=5e-3, rtol=5e-3)

    print("KERNEL_OK")
</pallas_src>

<mosaic_0001>
module attributes {stable_mosaic.version = 11 : i64} {
  func.func @_temporal_attention_kernel(%arg0: i32, %arg1: memref<2x8x32xf32, #tpu.memory_space<vmem>>, %arg2: memref<2x8xf32, #tpu.memory_space<vmem>>, %arg3: memref<1x32xf32, #tpu.memory_space<vmem>>, %arg4: memref<1x1xf32, #tpu.memory_space<smem>>, %arg5: memref<2x1xf32, #tpu.memory_space<vmem>>, %arg6: memref<2x32xf32, #tpu.memory_space<vmem>>, %arg7: memref<2x8xf32, #tpu.memory_space<vmem>>) attributes {dimension_semantics = [#tpu.dimension_semantics<parallel>], iteration_bounds = array<i64: 1>, scalar_prefetch = 0 : i64, scratch_operands = 0 : i64, tpu.core_type = #tpu.core_type<tc>, window_params = [{transform_indices = @transform_0, window_bounds = array<i64: 2, 8, 32>}, {transform_indices = @transform_1, window_bounds = array<i64: 2, 8>}, {pipeline_mode = #tpu.pipeline_mode<synchronous>, transform_indices = @transform_2, window_bounds = array<i64: 1, 32>}, {transform_indices = @transform_3, window_bounds = array<i64: 1, 1>}, {transform_indices = @transform_4, window_bounds = array<i64: 2, 1>}, {transform_indices = @transform_5, window_bounds = array<i64: 2, 32>}, {transform_indices = @transform_6, window_bounds = array<i64: 2, 8>}]} {
    %c0 = arith.constant 0 : index
    %c0_0 = arith.constant 0 : index
    %c0_1 = arith.constant 0 : index
    %0 = vector.load %arg1[%c0, %c0_0, %c0_1] : memref<2x8x32xf32, #tpu.memory_space<vmem>>, vector<2x8x32xf32>
    %c0_2 = arith.constant 0 : index
    %c0_3 = arith.constant 0 : index
    %1 = vector.load %arg2[%c0_2, %c0_3] : memref<2x8xf32, #tpu.memory_space<vmem>>, vector<2x8xf32>
    %c0_4 = arith.constant 0 : index
    %c0_5 = arith.constant 0 : index
    %2 = vector.load %arg3[%c0_4, %c0_5] : memref<1x32xf32, #tpu.memory_space<vmem>>, vector<1x32xf32>
    %c0_6 = arith.constant 0 : index
    %c0_7 = arith.constant 0 : index
    %3 = memref.load %arg4[%c0_6, %c0_7] : memref<1x1xf32, #tpu.memory_space<smem>>
    %4 = vector.shape_cast %2 : vector<1x32xf32> to vector<1x1x32xf32>
    %5 = vector.broadcast %4 : vector<1x1x32xf32> to vector<2x8x32xf32>
    %6 = arith.mulf %0, %5 : vector<2x8x32xf32>
    %cst = arith.constant dense<0.000000e+00> : vector<2x8xf32>
    %7 = vector.multi_reduction <add>, %6, %cst [2] : vector<2x8x32xf32> to vector<2x8xf32>
    %8 = vector.broadcast %3 : f32 to vector<2x8xf32>
    %9 = arith.addf %7, %8 : vector<2x8xf32>
    %cst_8 = arith.constant 0.000000e+00 : f32
    %10 = vector.broadcast %cst_8 : f32 to vector<2x8xf32>
    %11 = arith.cmpf oeq, %1, %10 : vector<2x8xf32>
    %cst_9 = arith.constant -1.000000e+04 : f32
    %12 = vector.broadcast %cst_9 : f32 to vector<2x8xf32>
    %13 = arith.select %11, %12, %9 : vector<2x8xi1>, vector<2x8xf32>
    %cst_10 = arith.constant dense<0xFF800000> : vector<2xf32>
    %14 = vector.multi_reduction <maximumf>, %13, %cst_10 [1] : vector<2x8xf32> to vector<2xf32>
    %15 = vector.shape_cast %14 : vector<2xf32> to vector<2x1xf32>
    %16 = vector.broadcast %15 : vector<2x1xf32> to vector<2x8xf32>
    %17 = arith.subf %13, %16 : vector<2x8xf32>
    %18 = math.exp %17 : vector<2x8xf32>
    %cst_11 = arith.constant dense<0.000000e+00> : vector<2xf32>
    %19 = vector.multi_reduction <add>, %18, %cst_11 [1] : vector<2x8xf32> to vector<2xf32>
    %20 = vector.shape_cast %19 : vector<2xf32> to vector<2x1xf32>
    %21 = tpu.reciprocal %20 {approx = true} : vector<2x1xf32> -> vector<2x1xf32>
    %22 = vector.broadcast %21 : vector<2x1xf32> to vector<2x8xf32>
    %23 = arith.mulf %18, %22 : vector<2x8xf32>
    %c0_12 = arith.constant 0 : index
    %c0_13 = arith.constant 0 : index
    %24 = vector.load %arg5[%c0_12, %c0_13] : memref<2x1xf32, #tpu.memory_space<vmem>>, vector<2x1xf32>
    %25 = vector.broadcast %24 : vector<2x1xf32> to vector<2x8xf32>
    %26 = arith.mulf %23, %25 : vector<2x8xf32>
    %cst_14 = arith.constant dense<0.000000e+00> : vector<2xf32>
    %27 = vector.multi_reduction <add>, %26, %cst_14 [1] : vector<2x8xf32> to vector<2xf32>
    %28 = vector.shape_cast %27 : vector<2xf32> to vector<2x1xf32>
    %cst_15 = arith.constant 9.99999971E-10 : f32
    %29 = vector.broadcast %cst_15 : f32 to vector<2x1xf32>
    %30 = arith.addf %28, %29 : vector<2x1xf32>
    %31 = tpu.reciprocal %30 {approx = true} : vector<2x1xf32> -> vector<2x1xf32>
    %32 = vector.broadcast %31 : vector<2x1xf32> to vector<2x8xf32>
    %33 = arith.mulf %26, %32 : vector<2x8xf32>
    %34 = vector.shape_cast %33 : vector<2x8xf32> to vector<2x8x1xf32>
    %35 = vector.broadcast %34 : vector<2x8x1xf32> to vector<2x8x32xf32>
    %36 = arith.mulf %35, %0 : vector<2x8x32xf32>
    %cst_16 = arith.constant dense<0.000000e+00> : vector<2x32xf32>
    %37 = vector.multi_reduction <add>, %36, %cst_16 [1] : vector<2x8x32xf32> to vector<2x32xf32>
    %c0_17 = arith.constant 0 : index
    %c0_18 = arith.constant 0 : index
    %38 = vector.load %arg6[%c0_17, %c0_18] : memref<2x32xf32, #tpu.memory_space<vmem>>, vector<2x32xf32>
    tpu.vector_store %arg6[%c0_17, %c0_18], %37 {strides = array<i32>} : memref<2x32xf32, #tpu.memory_space<vmem>>, vector<2x32xf32>,
    %c0_19 = arith.constant 0 : index
    %c0_20 = arith.constant 0 : index
    %39 = vector.load %arg7[%c0_19, %c0_20] : memref<2x8xf32, #tpu.memory_space<vmem>>, vector<2x8xf32>
    tpu.vector_store %arg7[%c0_19, %c0_20], %33 {strides = array<i32>} : memref<2x8xf32, #tpu.memory_space<vmem>>, vector<2x8xf32>,
    return
  }
  func.func @transform_0(%arg0: i32) -> (i32, i32, i32) {
    %c0_i32 = arith.constant 0 : i32
    %c0_i32_0 = arith.constant 0 : i32
    %c0_i32_1 = arith.constant 0 : i32
    return %arg0, %c0_i32, %c0_i32_0 : i32, i32, i32
  }
  func.func @transform_1(%arg0: i32) -> (i32, i32) {
    %c0_i32 = arith.constant 0 : i32
    %c0_i32_0 = arith.constant 0 : i32
    return %arg0, %c0_i32 : i32, i32
  }
  func.func @transform_2(%arg0: i32) -> (i32, i32) {
    %c0_i32 = arith.constant 0 : i32
    %c0_i32_0 = arith.constant 0 : i32
    %c0_i32_1 = arith.constant 0 : i32
    return %c0_i32, %c0_i32_0 : i32, i32
  }
  func.func @transform_3(%arg0: i32) -> (i32, i32) {
    %c0_i32 = arith.constant 0 : i32
    %c0_i32_0 = arith.constant 0 : i32
    %c0_i32_1 = arith.constant 0 : i32
    return %c0_i32, %c0_i32_0 : i32, i32
  }
  func.func @transform_4(%arg0: i32) -> (i32, i32) {
    %c0_i32 = arith.constant 0 : i32
    %c0_i32_0 = arith.constant 0 : i32
    return %arg0, %c0_i32 : i32, i32
  }
  func.func @transform_5(%arg0: i32) -> (i32, i32) {
    %c0_i32 = arith.constant 0 : i32
    %c0_i32_0 = arith.constant 0 : i32
    return %arg0, %c0_i32 : i32, i32
  }
  func.func @transform_6(%arg0: i32) -> (i32, i32) {
    %c0_i32 = arith.constant 0 : i32
    %c0_i32_0 = arith.constant 0 : i32
    return %arg0, %c0_i32 : i32, i32
  }
}

</mosaic_0001>

<bundles_post_ra>
// kernel: tpu_custom_call.1
= control target key start
LH: loop header
LB: loop body
LE: loop exit
PB: predicated region body
PF: predicated region fallthrough
CT: control target
= control target key end

     0   :  { %13 = vsyncpa [#allocation4], 0  ;;  %s341_s0 = inlined_call_operand.hbm [shape: f32[2,8,32], index: 0, kind: input, shape index: {}]   ;;  %s342_s1 = inlined_call_operand.vmem [shape: f32[2,8], index: 1, kind: input, shape index: {}]   ;;  %s343_s2 = inlined_call_operand.vmem [shape: f32[1,32], index: 2, kind: input, shape index: {}]   ;;  %s344_s3 = inlined_call_operand.<no memory space> [shape: f32[1,1], index: 3, kind: input, shape index: {}]   ;;  %s345_s4 = inlined_call_operand.vmem [shape: f32[2,1], index: 4, kind: input, shape index: {}]   ;;  %s346_s5 = inlined_call_operand.hbm [shape: f32[2,32], index: 5, kind: output, shape index: {0}]   ;;  %s347_s6 = inlined_call_operand.hbm [shape: f32[2,8], index: 6, kind: output, shape index: {1}]  }
   0x1   :  { %14 = vsyncpa [#allocation5], 0 }
   0x2   :  { %15 = vsyncpa [#allocation8], 0  ;;  %s20_s23 = sshll.u32 %s341_s0, 4  ;;  %s261_s24 = smov [#allocation3]   ;;  %s21_s23 = int_to_ptr.hbm [resolvable:$true] %s20_s23 }
   0x3   :  { %s22_s25 = sshll.u32 %s261_s24, 4  ;;  %s262_s26 = smov 128   ;;  %s23_s25 = int_to_ptr.vmem [resolvable:$true] %s22_s25 }
   0x4   :  { %s263_s27 = smov 8  }
   0x5   :  { %28 = dma.hbm_to_vmem [thread:$0]  %s21_s23, 256, %s23_s25, [#allocation4], %s262_s26, %s262_s26, %s263_s27  }
   0x6   :  { %255 = dma.done.wait [#allocation4], 256  }
   0x7   :  { %256 = vsyncadd [#allocation4], 4294967040  ;;  %v305_v0 = vld [vmem:[#allocation3] sm:$0xff]  ;;  %vm51_vm0 = vcmask 261120   ;;  %v311_v3 = vld [vmem:[#allocation3 + $0x8] sm:$0xff]  ;;  %v64_v8 = vlaneseq  ;;  %v58_v9 = vstv %s344_s3  ;;  %vm68_vm1 = vcmask 1041409  }
   0x8   :  { %v176_v1 = vld [vmem:[%s343_s2] ss:$0 sm:$0xff]  ;;  %vm72_vm3 = vcmask 58368   ;;  %v264_v21 = vmov 0   ;;  %s152_s11 = sshll.u32 %s347_s6, 4  ;;  %s266_s6 = smov [#allocation6]   ;;  %s153_s11 = int_to_ptr.hbm [resolvable:$true] %s152_s11 }
   0x9   :  { %v49_v2 = vmul.f32 %v176_v1, %v305_v0  ;;  %v50_v5 = vmul.f32 %v176_v1, %v311_v3  ;;  %v65_v10 = vand.u32 127, %v64_v8  ;;  %v43_v13 = vld [vmem:[%s342_s1] sm:$0x3]  ;;  %173 = vset.pattern.permute.xlu2 %v264_v21  ;;  %v99_v33 = vshrl.u32 %v64_v8, 7  ;;  %s265_s1 = smov [#allocation7]   ;;  %s139_s12 = sshll.u32 %s266_s6, 4  ;;  %s140_s12 = int_to_ptr.vmem [resolvable:$true] %s139_s12 }
   0xa   :  { %vm61_vm2 = vcmp.eq.f32.partialorder %v43_v13, 0.0  ;;  %v84_v20 = vld [vmem:[%s345_s4] sm:$0x3]  ;;  %s150_s4 = sshll.u32 %s265_s1, 4  ;;  %s141_s15 = sshll.u32 %s346_s5, 4  ;;  %vm131_vm4 = vcmask 254976   ;;  %s151_s4 = int_to_ptr.vmem [resolvable:$true] %s150_s4  ;;  %s142_s15 = int_to_ptr.hbm [resolvable:$true] %s141_s15 }
   0xb   :  { %v52_v4 = vsel %vm51_vm0, %v49_v2, 0.0  ;;  %v55_v6 = vsel %vm51_vm0, %v50_v5, 0.0  ;;  %87 = vperm.xlu2 %173, %v84_v20   ;;  %175 = vset.pattern.permute.xlu1 %v99_v33 }
   0xc   :  { %53 = vadd.xlane.f32.xlu0 %v52_v4 }
   0xd   :  { %174 = vset.pattern.permute.xlu0 %v99_v33 }
  0x14   :  { %56 = vadd.xlane.f32.xlu0 %v55_v6 }
  0x65   :  { %v88_v29 = vpop.permute.xlu2 %87 }
  0x7f   :  { %v54_v7 = vpop.xlane.xlu0 %53 }
  0x80   :  { %v59_v11 = vadd.f32 %v58_v9, %v54_v7 }
  0x82   :  { %v66_v15 = vperm.slane %v59_v11, %v65_v10 }
  0x87   :  { %v57_v12 = vpop.xlane.xlu0 %56 }
  0x88   :  { %v60_v14 = vadd.f32 %v58_v9, %v57_v12 }
  0x8a   :  { %v67_v16 = vperm.slane %v60_v14, %v65_v10 }
  0x8c   :  { %v69_v17 = vsel %vm68_vm1, %v67_v16, %v66_v15 }
  0x8d   :  { %v71_v18 = vsel %vm61_vm2, -10000.0, %v69_v17 }
  0x8e   :  { %v73_v19 = vsel %vm72_vm3, %v71_v18, -inf }
  0x8f   :  { %74 = vmax.xlane.f32.xlu1 %v73_v19 }
 0x102   :  { %v75_v22 = vpop.xlane.xlu1 %74 }
 0x103   :  { %v76_v23 = vsub.f32 %v71_v18, %v75_v22 }
 0x105   :  { %v77_v24 = vmul.f32 1.442695, %v76_v23 }
 0x107   :  { %177 = vpow2.f32 %v77_v24 }
 0x10d   :  { %v178_v25 = vpop.eup %177 }
 0x10e   :  { %v79_v26 = vsel %vm72_vm3, %v178_v25, 0.0 }
 0x10f   :  { %80 = vadd.xlane.f32.xlu1 %v79_v26 }
 0x182   :  { %v81_v27 = vpop.xlane.xlu1 %80 }
 0x183   :  { %179 = vrcp.f32 %v81_v27 }
 0x189   :  { %v180_v28 = vpop.eup %179 }
 0x18a   :  { %v83_v30 = vmul.f32 %v180_v28, %v178_v25 }
 0x18c   :  { %v90_v31 = vmul.f32 %v88_v29, %v83_v30 }
 0x18e   :  { %v91_v32 = vsel %vm72_vm3, %v90_v31, 0.0 }
 0x18f   :  { %92 = vadd.xlane.f32.xlu2 %v91_v32 }
 0x202   :  { %v93_v34 = vpop.xlane.xlu2 %92 }
 0x203   :  { %v94_v35 = vadd.f32 1e-09, %v93_v34 }
 0x205   :  { %181 = vrcp.f32 %v94_v35 }
 0x20b   :  { %v182_v36 = vpop.eup %181 }
 0x20c   :  { %v96_v37 = vmul.f32 %v182_v36, %v90_v31 }
 0x20e   :  { %133 = vst.msk [vmem:[#allocation7] sm:$0x3] %vm72_vm3, %v96_v37  ;;  %v104_v38 = vperm.slane %v96_v37, 1  ;;  %v97_v39 = vperm.slane %v96_v37, 0 }
 0x20f   :  { %155 = dma.vmem_to_hbm [thread:$0]  %s151_s4, 32, %s153_s11, [#allocation8]  }
 0x210   :  { %109 = vperm.xlu1 %175, %v104_v38   ;;  %102 = vperm.xlu0 %174, %v97_v39  }
 0x282   :  { %v110_v40 = vpop.permute.xlu1 %109  ;;  %v103_v41 = vpop.permute.xlu0 %102 }
 0x283   :  { %v112_v42 = vmul.f32 %v110_v40, %v311_v3  ;;  %v111_v43 = vmul.f32 %v103_v41, %v305_v0 }
 0x285   :  { %v120_v44 = vsel %vm51_vm0, %v112_v42, 0.0  ;;  %v113_v45 = vsel %vm51_vm0, %v111_v43, 0.0 }
 0x286   :  { %v121_v46 = vrot.slane %v120_v44, 4  ;;  %v114_v47 = vrot.slane %v113_v45, 4 }
 0x288   :  { %v122_v48 = vadd.f32 %v121_v46, %v120_v44  ;;  %v115_v49 = vadd.f32 %v114_v47, %v113_v45 }
 0x28a   :  { %v123_v50 = vrot.slane %v122_v48, 2  ;;  %v116_v51 = vrot.slane %v115_v49, 2 }
 0x28c   :  { %v124_v52 = vadd.f32 %v123_v50, %v122_v48  ;;  %v117_v53 = vadd.f32 %v116_v51, %v115_v49 }
 0x28e   :  { %v125_v54 = vrot.slane %v124_v52, 1  ;;  %v118_v55 = vrot.slane %v117_v53, 1 }
 0x290   :  { %v126_v56 = vadd.f32 %v125_v54, %v124_v52  ;;  %v119_v57 = vadd.f32 %v118_v55, %v117_v53 }
 0x292   :  { %v129_v58 = vsel %vm68_vm1, %v126_v56, %v119_v57 }
 0x293   :  { %132 = vst.msk [vmem:[#allocation6] sm:$0x3] %vm131_vm4, %v129_v58 }
 0x294   :  { %144 = dma.vmem_to_hbm [thread:$0]  %s140_s12, 32, %s142_s15, [#allocation5]  }
 0x295   :  { %257 = dma.done.wait [#allocation5], 32  }
 0x296   :  { %258 = vsyncadd [#allocation5], 4294967264 }
 0x297   :  { %259 = dma.done.wait [#allocation8], 32  }
 0x298   :  { %260 = vsyncadd [#allocation8], 4294967264 }
 0x299   :  { %164 = vsyncpa [#allocation4], 1 }
 0x29a   :  { %165 = vsyncpa [#allocation5], 1 }
 0x29b   :  { %166 = vsyncpa [#allocation8], 1 }

</bundles_post_ra>
